<compile_context>
chip_gen: v6e
topology: v6e:2x2x1
jax: 0.10.0
libtpu: 0.0.40
codegen_flags: <defaults>
</compile_context>

<pallas_src>
import jax
import jax.numpy as jnp
from jax.experimental import pallas as pl
from jax.experimental.pallas import tpu as pltpu

HIDDEN = 768        # MERT-v1-95M hidden size (fixed by Linear(768, 256))
CLS_HID = 256
NUM_CLASSES = 10
FRAME = 320         # samples per frame for the synthetic backbone stub
SEQ = 8             # frames (sequence length of last_hidden_state)
BATCH = 2


# ----------------------------- Pallas kernel -------------------------------

def mert_classifier_kernel(xf_ref, pool_ref, wf_ref, bf_ref,
                           w1_ref, b1_ref, w2_ref, b2_ref, o_ref):
    """Fused MERT-stub backbone + mean-pool + classifier head.

    xf_ref  : (B*T, FRAME)        bf16 framed audio
    pool_ref: (B, B*T)            bf16 mean-pool matrix (1/T per valid slot)
    wf_ref  : (FRAME, HIDDEN)     bf16
    bf_ref  : (1, HIDDEN)         f32
    w1_ref  : (HIDDEN, CLS_HID)   bf16
    b1_ref  : (1, CLS_HID)        f32
    w2_ref  : (CLS_HID, NUM_CLS)  bf16
    b2_ref  : (1, NUM_CLS)        f32
    o_ref   : (B, NUM_CLS)        f32 logits
    """
    # TODO(synk): the real m-a-p/MERT-v1-95M backbone (7-layer conv feature
    # extractor + 12 pretrained transformer layers) cannot be reproduced
    # in-script; this deterministic bf16 linear+GELU frame encoder only
    # matches its output shape/dtype (B, T, 768).
    h = jnp.dot(xf_ref[...], wf_ref[...], preferred_element_type=jnp.float32)
    h = jax.nn.gelu(h + bf_ref[...])                       # (B*T, HIDDEN) f32

    # features = mert_output.mean(dim=1), expressed as a tiny bf16 MXU matmul
    # (pool[b, b*T + t] = 1/T = 1/8, exact in bf16) so there is no
    # cross-sublane reduction and the 1/T scale is folded into the weights.
    feats = jnp.dot(pool_ref[...], h.astype(jnp.bfloat16),
                    preferred_element_type=jnp.float32)    # (B, HIDDEN) f32

    # nn.Dropout(0.3) / nn.Dropout(0.2) are identity at inference (eval mode).
    z1 = jnp.dot(feats.astype(jnp.bfloat16), w1_ref[...],
                 preferred_element_type=jnp.float32)
    z1 = jnp.maximum(z1 + b1_ref[...], 0.0)                # Linear(768,256)+ReLU, f32
    z2 = jnp.dot(z1.astype(jnp.bfloat16), w2_ref[...],
                 preferred_element_type=jnp.float32)
    o_ref[...] = (z2 + b2_ref[...]).astype(o_ref.dtype)    # Linear(256,10)


# ------------------------------ wrapper -------------------------------------

def init_params(key):
    k = jax.random.split(key, 5)
    w_feat = (jax.random.normal(k[0], (FRAME, HIDDEN), jnp.float32)
              * (1.0 / jnp.sqrt(FRAME)))
    w1 = (jax.random.normal(k[1], (HIDDEN, CLS_HID), jnp.float32)
          * (1.0 / jnp.sqrt(HIDDEN)))
    w2 = (jax.random.normal(k[3], (CLS_HID, NUM_CLASSES), jnp.float32)
          * (1.0 / jnp.sqrt(CLS_HID)))
    return {
        # Matmul weights stored bf16 (native MXU path, halves HBM traffic);
        # contraction dims shipped un-padded — Mosaic masks K=320 internally.
        "w_feat": w_feat.astype(jnp.bfloat16),
        "b_feat": jnp.zeros((1, HIDDEN), jnp.float32),
        "w1": w1.astype(jnp.bfloat16),
        "b1": jax.random.normal(k[2], (1, CLS_HID), jnp.float32) * 0.01,
        "w2": w2.astype(jnp.bfloat16),                       # (256, 10), no padding
        "b2": jax.random.normal(k[4], (1, NUM_CLASSES), jnp.float32) * 0.01,
    }


def mert_classifier_forward(x, params):
    # if x.dim() == 1: x = x.unsqueeze(0)
    if x.ndim == 1:
        x = x[None, :]
    B, L = x.shape
    T = L // FRAME  # trailing samples beyond T*FRAME are dropped (intended)

    xf = x[:, : T * FRAME].reshape(B * T, FRAME).astype(jnp.bfloat16)

    # Mean-pool matrix: pool[b, b*T + t] = 1/T  (1/8 is exact in bf16).
    rows = jnp.arange(B)[:, None]
    cols = jnp.arange(B * T)[None, :]
    pool = jnp.where((cols // T) == rows, 1.0 / T, 0.0).astype(jnp.bfloat16)

    # Grid-less fused kernel: everything (< 2 MB) lives in VMEM as full-array
    # blocks — no software pipeline / double buffering for a 1-step problem.
    vmem = lambda: pl.BlockSpec(memory_space=pltpu.MemorySpace.VMEM)
    logits = pl.pallas_call(
        mert_classifier_kernel,
        out_shape=jax.ShapeDtypeStruct((B, NUM_CLASSES), jnp.float32),
        in_specs=[vmem() for _ in range(8)],
        out_specs=vmem(),
    )(xf, pool, params["w_feat"], params["b_feat"],
      params["w1"], params["b1"], params["w2"], params["b2"])
    return logits


if __name__ == "__main__":
    key = jax.random.PRNGKey(0)
    pkey, xkey = jax.random.split(key)
    params = init_params(pkey)

    # small raw-audio input: batch=2, SEQ*FRAME = 2560 samples each
    x = jax.random.normal(xkey, (BATCH, SEQ * FRAME), dtype=jnp.float32)

    logits = mert_classifier_forward(x, params)
    jax.block_until_ready(logits)
    assert logits.shape == (BATCH, NUM_CLASSES)
    assert logits.dtype == jnp.float32
    print("KERNEL_OK")
</pallas_src>

<mosaic_0001>
module attributes {stable_mosaic.version = 11 : i64} {
  func.func @mert_classifier_kernel(%arg0: memref<16x320xbf16, #tpu.memory_space<vmem>>, %arg1: memref<2x16xbf16, #tpu.memory_space<vmem>>, %arg2: memref<320x768xbf16, #tpu.memory_space<vmem>>, %arg3: memref<1x768xf32, #tpu.memory_space<vmem>>, %arg4: memref<768x256xbf16, #tpu.memory_space<vmem>>, %arg5: memref<1x256xf32, #tpu.memory_space<vmem>>, %arg6: memref<256x10xbf16, #tpu.memory_space<vmem>>, %arg7: memref<1x10xf32, #tpu.memory_space<vmem>>, %arg8: memref<2x10xf32, #tpu.memory_space<vmem>>) attributes {dimension_semantics = [], scalar_prefetch = 0 : i64, scratch_operands = 0 : i64, tpu.core_type = #tpu.core_type<tc>} {
    %c0 = arith.constant 0 : index
    %c0_0 = arith.constant 0 : index
    %0 = vector.load %arg0[%c0, %c0_0] : memref<16x320xbf16, #tpu.memory_space<vmem>>, vector<16x320xbf16>
    %c0_1 = arith.constant 0 : index
    %c0_2 = arith.constant 0 : index
    %1 = vector.load %arg2[%c0_1, %c0_2] : memref<320x768xbf16, #tpu.memory_space<vmem>>, vector<320x768xbf16>
    %cst = arith.constant dense<0.000000e+00> : vector<16x768xf32>
    %2 = tpu.matmul %0, %1, %cst {dimension_numbers = #tpu.dot_dimension_numbers<[1], [0], [0], [1], [0, 0, 1, 1], [], []>} : vector<16x320xbf16>, vector<320x768xbf16>, vector<16x768xf32> -> vector<16x768xf32>
    %c0_3 = arith.constant 0 : index
    %c0_4 = arith.constant 0 : index
    %3 = vector.load %arg3[%c0_3, %c0_4] : memref<1x768xf32, #tpu.memory_space<vmem>>, vector<1x768xf32>
    %4 = vector.broadcast %3 : vector<1x768xf32> to vector<16x768xf32>
    %5 = arith.addf %2, %4 : vector<16x768xf32>
    %6 = arith.mulf %5, %5 : vector<16x768xf32>
    %7 = arith.mulf %5, %6 : vector<16x768xf32>
    %cst_5 = arith.constant 4.471500e-02 : f32
    %8 = vector.broadcast %cst_5 : f32 to vector<16x768xf32>
    %9 = arith.mulf %8, %7 : vector<16x768xf32>
    %10 = arith.addf %5, %9 : vector<16x768xf32>
    %cst_6 = arith.constant 0.797884583 : f32
    %11 = vector.broadcast %cst_6 : f32 to vector<16x768xf32>
    %12 = arith.mulf %11, %10 : vector<16x768xf32>
    %13 = math.tanh %12 : vector<16x768xf32>
    %cst_7 = arith.constant 1.000000e+00 : f32
    %14 = vector.broadcast %cst_7 : f32 to vector<16x768xf32>
    %15 = arith.addf %14, %13 : vector<16x768xf32>
    %cst_8 = arith.constant 5.000000e-01 : f32
    %16 = vector.broadcast %cst_8 : f32 to vector<16x768xf32>
    %17 = arith.mulf %16, %15 : vector<16x768xf32>
    %18 = arith.mulf %5, %17 : vector<16x768xf32>
    %c0_9 = arith.constant 0 : index
    %c0_10 = arith.constant 0 : index
    %19 = vector.load %arg1[%c0_9, %c0_10] : memref<2x16xbf16, #tpu.memory_space<vmem>>, vector<2x16xbf16>
    %20 = arith.truncf %18 : vector<16x768xf32> to vector<16x768xbf16>
    %cst_11 = arith.constant dense<0.000000e+00> : vector<2x768xf32>
    %21 = tpu.matmul %19, %20, %cst_11 {dimension_numbers = #tpu.dot_dimension_numbers<[1], [0], [0], [1], [0, 0, 1, 1], [], []>} : vector<2x16xbf16>, vector<16x768xbf16>, vector<2x768xf32> -> vector<2x768xf32>
    %22 = arith.truncf %21 : vector<2x768xf32> to vector<2x768xbf16>
    %c0_12 = arith.constant 0 : index
    %c0_13 = arith.constant 0 : index
    %23 = vector.load %arg4[%c0_12, %c0_13] : memref<768x256xbf16, #tpu.memory_space<vmem>>, vector<768x256xbf16>
    %cst_14 = arith.constant dense<0.000000e+00> : vector<2x256xf32>
    %24 = tpu.matmul %22, %23, %cst_14 {dimension_numbers = #tpu.dot_dimension_numbers<[1], [0], [0], [1], [0, 0, 1, 1], [], []>} : vector<2x768xbf16>, vector<768x256xbf16>, vector<2x256xf32> -> vector<2x256xf32>
    %c0_15 = arith.constant 0 : index
    %c0_16 = arith.constant 0 : index
    %25 = vector.load %arg5[%c0_15, %c0_16] : memref<1x256xf32, #tpu.memory_space<vmem>>, vector<1x256xf32>
    %26 = vector.broadcast %25 : vector<1x256xf32> to vector<2x256xf32>
    %27 = arith.addf %24, %26 : vector<2x256xf32>
    %cst_17 = arith.constant 0.000000e+00 : f32
    %28 = vector.broadcast %cst_17 : f32 to vector<2x256xf32>
    %29 = arith.maximumf %27, %28 : vector<2x256xf32>
    %30 = arith.truncf %29 : vector<2x256xf32> to vector<2x256xbf16>
    %c0_18 = arith.constant 0 : index
    %c0_19 = arith.constant 0 : index
    %31 = vector.load %arg6[%c0_18, %c0_19] : memref<256x10xbf16, #tpu.memory_space<vmem>>, vector<256x10xbf16>
    %cst_20 = arith.constant dense<0.000000e+00> : vector<2x10xf32>
    %32 = tpu.matmul %30, %31, %cst_20 {dimension_numbers = #tpu.dot_dimension_numbers<[1], [0], [0], [1], [0, 0, 1, 1], [], []>} : vector<2x256xbf16>, vector<256x10xbf16>, vector<2x10xf32> -> vector<2x10xf32>
    %c0_21 = arith.constant 0 : index
    %c0_22 = arith.constant 0 : index
    %33 = vector.load %arg7[%c0_21, %c0_22] : memref<1x10xf32, #tpu.memory_space<vmem>>, vector<1x10xf32>
    %34 = vector.broadcast %33 : vector<1x10xf32> to vector<2x10xf32>
    %35 = arith.addf %32, %34 : vector<2x10xf32>
    %c0_23 = arith.constant 0 : index
    %c0_24 = arith.constant 0 : index
    %36 = vector.load %arg8[%c0_23, %c0_24] : memref<2x10xf32, #tpu.memory_space<vmem>>, vector<2x10xf32>
    tpu.vector_store %arg8[%c0_23, %c0_24], %35 {strides = array<i32>} : memref<2x10xf32, #tpu.memory_space<vmem>>, vector<2x10xf32>,
    return
  }
}

</mosaic_0001>

<bundles_post_ra>
// kernel: tpu_custom_call.1
= control target key start
LH: loop header
LB: loop body
LE: loop exit
PB: predicated region body
PF: predicated region fallthrough
CT: control target
= control target key end

     0   :  { %13 = vsyncpa [#allocation3], 0  ;;  %s3197_s0 = inlined_call_operand.vmem [shape: bf16[16,320], index: 0, kind: input, shape index: {}]   ;;  %s3198_s1 = inlined_call_operand.vmem [shape: bf16[2,16], index: 1, kind: input, shape index: {}]   ;;  %s3199_s2 = inlined_call_operand.hbm [shape: bf16[320,768], index: 2, kind: input, shape index: {}]   ;;  %s3200_s3 = inlined_call_operand.vmem [shape: f32[1,768], index: 3, kind: input, shape index: {}]   ;;  %s3201_s4 = inlined_call_operand.hbm [shape: bf16[768,256], index: 4, kind: input, shape index: {}]   ;;  %s3202_s5 = inlined_call_operand.vmem [shape: f32[1,256], index: 5, kind: input, shape index: {}]   ;;  %s3203_s6 = inlined_call_operand.vmem [shape: bf16[256,10], index: 6, kind: input, shape index: {}]   ;;  %s3204_s7 = inlined_call_operand.vmem [shape: f32[1,10], index: 7, kind: input, shape index: {}]   ;;  %s3205_s8 = inlined_call_operand.hbm [shape: f32[2,10], index: 8, kind: output, shape index: {}]  }
   0x1   :  { %14 = vsyncpa [#allocation6], 0 }
   0x2   :  { %15 = vsyncpa [#allocation4], 0  ;;  %s2954_s27 = smov [#allocation2]  }
   0x3   :  { %s25_s28 = sshll.u32 %s2954_s27, 4  ;;  %s26_s28 = int_to_ptr.vmem [resolvable:$true] %s25_s28 }
   0x4   :  { %s2896_s29 = scalar_lea.vmem %s26_s28, 15360  ;;  %p2901_p1 = scmp.lt.s32.totalorder %s26_s28, %s26_s28 }
   0x5   :  { %p2897_p0 = scmp.ne.s32.totalorder %s26_s28, %s2896_s29  ;;  %p2902_p2 = scmp.lt.s32.totalorder %s2896_s29, %s2896_s29 }
   0x7   :  { %p2903_p3 = por %p2902_p2, %p2901_p1 }
   0x9   :  { %p2904_p4 = pnand %p2903_p3, %p2897_p0 }
   0xb   :  { %2907 = shalt.err (!%p2904_p4)
}
   0xc   :  { %s2955_s30 = smov 384   ;;  %s2956_s9 = smov 24  }
   0xd   :  { %31 = dma.hbm_to_vmem [thread:$0]  %s3199_s2, 15360, %s26_s28, [#allocation3], %s2955_s30, %s2955_s30, %s2956_s9  }
   0xe   :  { %s2957_s12 = smov [#allocation5]  }
   0xf   :  { %s39_s13 = sshll.u32 %s2957_s12, 4  ;;  %s40_s13 = int_to_ptr.vmem [resolvable:$true] %s39_s13 }
  0x10   :  { %s2916_s14 = scalar_lea.vmem %s40_s13, 12288  ;;  %p2921_p6 = scmp.lt.s32.totalorder %s40_s13, %s40_s13 }
  0x11   :  { %p2917_p5 = scmp.ne.s32.totalorder %s40_s13, %s2916_s14  ;;  %p2922_p7 = scmp.lt.s32.totalorder %s2916_s14, %s2916_s14 }
  0x13   :  { %p2923_p8 = por %p2922_p7, %p2921_p6 }
  0x15   :  { %p2924_p9 = pnand %p2923_p8, %p2917_p5 }
  0x17   :  { %2927 = shalt.err (!%p2924_p9)
}
  0x18   :  { %s2958_s15 = smov 128   ;;  %s2959_s16 = smov 8  }
  0x19   :  { %45 = dma.hbm_to_vmem [thread:$0]  %s3201_s4, 12288, %s40_s13, [#allocation6], %s2958_s15, %s2958_s15, %s2959_s16  }
  0x1a   :  { %2948 = dma.done.wait [#allocation3], 15360  }
  0x1b   :  { %2949 = vsyncadd [#allocation3], 4294951936 }
  0x1c   :  { %2950 = dma.done.wait [#allocation6], 12288  }
  0x1d   :  { %2951 = vsyncadd [#allocation6], 4294955008  ;;  %v2960_v0 = vmov 0   ;;  %v2520_v1 = vld [vmem:[#allocation2 + $0x154] ss:$24 sps:$4 sm:$0xff]   ;;  %vm830_vm0 = vcmask 523264  }
  0x1e   :  { %909 = vmatprep.mubr.bf16.mxu1 %v2960_v0  ;;  %v2522_v2 = vld [vmem:[#allocation2 + $0x394] ss:$24 sps:$4 sm:$0xff]   ;;  %834 = vmatprep.subr.bf16.mxu0 %v2520_v1  ;;  %v2524_v3 = vld [vmem:[#allocation2 + $0x150] ss:$24 sps:$4 sm:$0xff]   ;;  %v2526_v5 = vld [vmem:[#allocation2 + $0x124] ss:$24 sps:$4 sm:$0xff]  }
  0x1f   :  { %v2525_v4 = vld [vmem:[#allocation2 + $0x390] ss:$24 sps:$4 sm:$0xff]   ;;  %885 = vmatprep.subr.bf16.mxu1 %v2522_v2  ;;  %835 = vmatpush1.bf16.msra.mxu0 %v2524_v3  ;;  %v2528_v6 = vld [vmem:[#allocation2 + $0x364] ss:$24 sps:$4 sm:$0xff]   ;;  %v2530_v7 = vld [vmem:[#allocation2 + $0x120] ss:$24 sps:$4 sm:$0xff]  }
  0x20   :  { %886 = vmatpush1.bf16.msra.mxu1 %v2525_v4  ;;  %836 = vmatprep.subr.bf16.mxu0 %v2526_v5  ;;  %v2531_v8 = vld [vmem:[#allocation2 + $0x360] ss:$24 sps:$4 sm:$0xff]   ;;  %v2532_v9 = vld [vmem:[#allocation2 + $0xf4] ss:$24 sps:$4 sm:$0xff]   ;;  %v2536_v11 = vld [vmem:[#allocation2 + $0xf0] ss:$24 sps:$4 sm:$0xff]  }
  0x21   :  { %887 = vmatprep.subr.bf16.mxu1 %v2528_v6  ;;  %v2534_v10 = vld [vmem:[#allocation2 + $0x334] ss:$24 sps:$4 sm:$0xff]   ;;  %v2537_v12 = vld [vmem:[#allocation2 + $0x330] ss:$24 sps:$4 sm:$0xff]   ;;  %v2538_v13 = vld [vmem:[#allocation2 + $0xc4] ss:$24 sps:$4 sm:$0xff]  }
  0x22   :  { %v2540_v14 = vld [vmem:[#allocation2 + $0x304] ss:$24 sps:$4 sm:$0xff]   ;;  %v2542_v15 = vld [vmem:[#allocation2 + $0xc0] ss:$24 sps:$4 sm:$0xff]   ;;  %v2544_v17 = vld [vmem:[#allocation2 + $0x94] ss:$24 sps:$4 sm:$0xff]  }
  0x23   :  { %837 = vmatpush1.bf16.msra.mxu0 %v2530_v7  ;;  %v2543_v16 = vld [vmem:[#allocation2 + $0x300] ss:$24 sps:$4 sm:$0xff]   ;;  %v2548_v18 = vld [vmem:[#allocation2 + $0x15c] ss:$24 sps:$4 sm:$0xff]   ;;  %v2549_v21 = vld [vmem:[#allocation2 + $0x90] ss:$24 sps:$4 sm:$0xff]  }
  0x24   :  { %888 = vmatpush1.bf16.msra.mxu1 %v2531_v8  ;;  %838 = vmatprep.subr.bf16.mxu0 %v2532_v9  ;;  %v3017_v19 = vld [vmem:[%s3197_s0 + $0x8] ss:$12 sps:$4 sm:$0xff]   ;;  %v2546_v20 = vld [vmem:[#allocation2 + $0x158] ss:$24 sps:$4 sm:$0xff]   ;;  %v2551_v22 = vld [vmem:[#allocation2 + $0x64] ss:$24 sps:$4 sm:$0xff]  }
  0x25   :  { %889 = vmatprep.subr.bf16.mxu1 %v2534_v10  ;;  %v2555_v23 = vld [vmem:[#allocation2 + $0x12c] ss:$24 sps:$4 sm:$0xff]   ;;  %v2553_v24 = vld [vmem:[#allocation2 + $0x128] ss:$24 sps:$4 sm:$0xff]   ;;  %v2561_v27 = vld [vmem:[#allocation2 + $0xfc] ss:$24 sps:$4 sm:$0xff]  }
  0x26   :  { %v2556_v25 = vld [vmem:[#allocation2 + $0x60] ss:$24 sps:$4 sm:$0xff]   ;;  %v2557_v26 = vld [vmem:[#allocation2 + $0x34] ss:$24 sps:$4 sm:$0xff]   ;;  %v2562_v29 = vld [vmem:[#allocation2 + $0x30] ss:$24 sps:$4 sm:$0xff]  }
  0x27   :  { %839 = vmatpush1.bf16.msra.mxu0 %v2536_v11  ;;  %v2559_v28 = vld [vmem:[#allocation2 + $0xf8] ss:$24 sps:$4 sm:$0xff]   ;;  %v2563_v30 = vld [vmem:[#allocation2 + $0x4] ss:$24 sps:$4 sm:$0xff]   ;;  %v2565_v32 = vld [vmem:[#allocation2 + $0xc8] ss:$24 sps:$4 sm:$0xff]  }
  0x28   :  { %890 = vmatpush1.bf16.msra.mxu1 %v2537_v12  ;;  %840 = vmatprep.subr.bf16.mxu0 %v2538_v13  ;;  %v2567_v31 = vld [vmem:[#allocation2 + $0xcc] ss:$24 sps:$4 sm:$0xff]   ;;  %v2568_v33 = vld [vmem:[#allocation2] ss:$24 sps:$4 sm:$0xff]   ;;  %v2573_v35 = vld [vmem:[#allocation2 + $0x9c] ss:$24 sps:$4 sm:$0xff]  }
  0x29   :  { %891 = vmatprep.subr.bf16.mxu1 %v2540_v14  ;;  %v2569_v34 = vld [vmem:[#allocation2 + $0x2d4] ss:$24 sps:$4 sm:$0xff]   ;;  %v2571_v36 = vld [vmem:[#allocation2 + $0x98] ss:$24 sps:$4 sm:$0xff]   ;;  %v2575_v38 = vld [vmem:[#allocation2 + $0x2a4] ss:$24 sps:$4 sm:$0xff]  }
  0x2a   :  { %v2574_v37 = vld [vmem:[#allocation2 + $0x2d0] ss:$24 sps:$4 sm:$0xff]   ;;  %v2579_v39 = vld [vmem:[#allocation2 + $0x6c] ss:$24 sps:$4 sm:$0xff]   ;;  %v2580_v41 = vld [vmem:[#allocation2 + $0x2a0] ss:$24 sps:$4 sm:$0xff]  }
  0x2b   :  { %841 = vmatpush1.bf16.msra.mxu0 %v2542_v15  ;;  %v2577_v40 = vld [vmem:[#allocation2 + $0x68] ss:$24 sps:$4 sm:$0xff]   ;;  %v2581_v42 = vld [vmem:[#allocation2 + $0x274] ss:$24 sps:$4 sm:$0xff]   ;;  %v2583_v44 = vld [vmem:[#allocation2 + $0x38] ss:$24 sps:$4 sm:$0xff]  }
  0x2c   :  { %892 = vmatpush1.bf16.msra.mxu1 %v2543_v16  ;;  %842 = vmatprep.subr.bf16.mxu0 %v2544_v17  ;;  %v2585_v43 = vld [vmem:[#allocation2 + $0x3c] ss:$24 sps:$4 sm:$0xff]   ;;  %v2586_v45 = vld [vmem:[#allocation2 + $0x270] ss:$24 sps:$4 sm:$0xff]   ;;  %v2591_v47 = vld [vmem:[#allocation2 + $0xc] ss:$24 sps:$4 sm:$0xff]  }
  0x2d   :  { %920 = vmatprep.subr.bf16.mxu1 %v2548_v18  ;;  %v2587_v46 = vld [vmem:[#allocation2 + $0x244] ss:$24 sps:$4 sm:$0xff]   ;;  %v2589_v48 = vld [vmem:[#allocation2 + $0x8] ss:$24 sps:$4 sm:$0xff]   ;;  %v2593_v50 = vld [vmem:[#allocation2 + $0x214] ss:$24 sps:$4 sm:$0xff]  }
  0x2e   :  { %v2592_v49 = vld [vmem:[#allocation2 + $0x240] ss:$24 sps:$4 sm:$0xff]   ;;  %v3024_v51 = vld [vmem:[%s3197_s0 + $0x4] ss:$12 sps:$4 sm:$0xff]   ;;  %v2597_v52 = vld [vmem:[#allocation2 + $0x2dc] ss:$24 sps:$4 sm:$0xff]  }
  0x2f   :  { %2371 = vmatmul.mubr.msk.bf16.vlgmr.msra.gmra.mxu1 %vm830_vm0, %v3017_v19  ;;  %843 = vmatpush1.bf16.msra.mxu0 %v2549_v21  ;;  %v2595_v53 = vld [vmem:[#allocation2 + $0x2d8] ss:$24 sps:$4 sm:$0xff]   ;;  %v2599_v55 = vld [vmem:[#allocation2 + $0x1e4] ss:$24 sps:$4 sm:$0xff]   ;;  %v2601_v57 = vld [vmem:[#allocation2 + $0x2a8] ss:$24 sps:$4 sm:$0xff]  }
  0x30   :  { %921 = vmatpush1.bf16.msra.mxu1 %v2546_v20  ;;  %844 = vmatprep.subr.bf16.mxu0 %v2551_v22  ;;  %v2598_v54 = vld [vmem:[#allocation2 + $0x210] ss:$24 sps:$4 sm:$0xff]   ;;  %v2603_v56 = vld [vmem:[#allocation2 + $0x2ac] ss:$24 sps:$4 sm:$0xff]   ;;  %v2604_v58 = vld [vmem:[#allocation2 + $0x1e0] ss:$24 sps:$4 sm:$0xff]  }
  0x31   :  { %922 = vmatprep.subr.bf16.mxu1 %v2555_v23  ;;  %866 = vmatprep.mubr.bf16.mxu0 %v3024_v51  ;;  %v2605_v59 = vld [vmem:[#allocation2 + $0x1b4] ss:$24 sps:$4 sm:$0xff]   ;;  %v2607_v61 = vld [vmem:[#allocation2 + $0x278] ss:$24 sps:$4 sm:$0xff]   ;;  %v2611_v63 = vld [vmem:[#allocation2 + $0x184] ss:$24 sps:$4 sm:$0xff]  }
  0x32   :  { %952 = vmatprep.mubr.bf16.mxu1 %v3024_v51  ;;  %v2609_v60 = vld [vmem:[#allocation2 + $0x27c] ss:$24 sps:$4 sm:$0xff]   ;;  %v2610_v62 = vld [vmem:[#allocation2 + $0x1b0] ss:$24 sps:$4 sm:$0xff]   ;;  %v2615_v1 = vld [vmem:[#allocation2 + $0x24c] ss:$24 sps:$4 sm:$0xff]  }
  0x33   :  { %845 = vmatpush1.bf16.msra.mxu0 %v2556_v25  ;;  %v2613_v2 = vld [vmem:[#allocation2 + $0x248] ss:$24 sps:$4 sm:$0xff]   ;;  %v2622_v4 = vld [vmem:[#allocation2 + $0x21c] ss:$24 sps:$4 sm:$0xff]   ;;  %v2620_v7 = vld [vmem:[#allocation2 + $0x218] ss:$24 sps:$4 sm:$0xff]  }
  0x34   :  { %923 = vmatpush1.bf16.msra.mxu1 %v2553_v24  ;;  %846 = vmatprep.subr.bf16.mxu0 %v2557_v26  ;;  %v2616_v3 = vld [vmem:[#allocation2 + $0x180] ss:$24 sps:$4 sm:$0xff]   ;;  %v2625_v5 = vld [vmem:[#allocation2 + $0x39c] ss:$24 sps:$4 sm:$0xff]   ;;  %v2628_v9 = vld [vmem:[#allocation2 + $0x1ec] ss:$24 sps:$4 sm:$0xff]  }
  0x35   :  { %924 = vmatprep.subr.bf16.mxu1 %v2561_v27  ;;  %v3031_v6 = vld [vmem:[%s3197_s0] ss:$12 sps:$4 sm:$0xff]   ;;  %v2623_v8 = vld [vmem:[#allocation2 + $0x398] ss:$24 sps:$4 sm:$0xff]   ;;  %v2634_v13 = vld [vmem:[#allocation2 + $0x1bc] ss:$24 sps:$4 sm:$0xff]  }
  0x36   :  { %v2631_v10 = vld [vmem:[#allocation2 + $0x36c] ss:$24 sps:$4 sm:$0xff]   ;;  %v2626_v11 = vld [vmem:[#allocation2 + $0x1e8] ss:$24 sps:$4 sm:$0xff]   ;;  %v2637_v14 = vld [vmem:[#allocation2 + $0x33c] ss:$24 sps:$4 sm:$0xff]  }
  0x37   :  { %847 = vmatpush1.bf16.msra.mxu0 %v2562_v29  ;;  %v2629_v12 = vld [vmem:[#allocation2 + $0x368] ss:$24 sps:$4 sm:$0xff]   ;;  %v2632_v15 = vld [vmem:[#allocation2 + $0x1b8] ss:$24 sps:$4 sm:$0xff]   ;;  %v2640_v17 = vld [vmem:[#allocation2 + $0x18c] ss:$24 sps:$4 sm:$0xff]  }
  0x38   :  { %925 = vmatpush1.bf16.msra.mxu1 %v2559_v28  ;;  %848 = vmatprep.subr.bf16.mxu0 %v2563_v30  ;;  %v2635_v16 = vld [vmem:[#allocation2 + $0x338] ss:$24 sps:$4 sm:$0xff]   ;;  %v2643_v18 = vld [vmem:[#allocation2 + $0x30c] ss:$24 sps:$4 sm:$0xff]   ;;  %v2638_v20 = vld [vmem:[#allocation2 + $0x188] ss:$24 sps:$4 sm:$0xff]  }
  0x39   :  { %926 = vmatprep.subr.bf16.mxu1 %v2567_v31  ;;  %v2641_v21 = vld [vmem:[#allocation2 + $0x308] ss:$24 sps:$4 sm:$0xff]   ;;  %v2646_v22 = vld [vmem:[#allocation2 + $0x164] ss:$24 sps:$4 sm:$0xff]   ;;  %v2649_v25 = vld [vmem:[#allocation2 + $0x134] ss:$24 sps:$4 sm:$0xff]  }
  0x3a   :  { %v2682_v23 = vld [vmem:[#allocation2 + $0x3a4] ss:$24 sps:$4 sm:$0xff]   ;;  %v2644_v24 = vld [vmem:[#allocation2 + $0x160] ss:$24 sps:$4 sm:$0xff]   ;;  %v2688_v27 = vld [vmem:[#allocation2 + $0x374] ss:$24 sps:$4 sm:$0xff]  }
  0x3b   :  { %849 = vmatpush1.bf16.msra.mxu0 %v2568_v33  ;;  %v2680_v26 = vld [vmem:[#allocation2 + $0x3a0] ss:$24 sps:$4 sm:$0xff]   ;;  %v2647_v28 = vld [vmem:[#allocation2 + $0x130] ss:$24 sps:$4 sm:$0xff]   ;;  %v2652_v30 = vld [vmem:[#allocation2 + $0x104] ss:$24 sps:$4 sm:$0xff]  }
  0x3c   :  { %927 = vmatpush1.bf16.msra.mxu1 %v2565_v32  ;;  %850 = vmatprep.subr.bf16.mxu0 %v2569_v34  ;;  %v2686_v29 = vld [vmem:[#allocation2 + $0x370] ss:$24 sps:$4 sm:$0xff]   ;;  %v2694_v31 = vld [vmem:[#allocation2 + $0x344] ss:$24 sps:$4 sm:$0xff]   ;;  %v2650_v32 = vld [vmem:[#allocation2 + $0x100] ss:$24 sps:$4 sm:$0xff]  }
  0x3d   :  { %928 = vmatprep.subr.bf16.mxu1 %v2573_v35  ;;  %v2692_v33 = vld [vmem:[#allocation2 + $0x340] ss:$24 sps:$4 sm:$0xff]   ;;  %v2655_v34 = vld [vmem:[#allocation2 + $0xd4] ss:$24 sps:$4 sm:$0xff]   ;;  %vm1207_vm1 = vcmask 130048   ;;  %s2961_s9 = smov [#allocation7]  }
  0x3e   :  { %v2700_v35 = vld [vmem:[#allocation2 + $0x314] ss:$24 sps:$4 sm:$0xff]   ;;  %s2238_s10 = sshll.u32 %s2961_s9, 4  ;;  %vm2230_vm2 = vcmask 74752   ;;  %s2239_s10 = int_to_ptr.vmem [resolvable:$true] %s2238_s10 }
  0x3f   :  { %851 = vmatpush2.bf16.msra.mxu0 %v2574_v37  ;;  %v2698_v37 = vld [vmem:[#allocation2 + $0x310] ss:$24 sps:$4 sm:$0xff]   ;;  %s2928_s11 = scalar_lea.vmem %s2239_s10, 32  ;;  %p2933_p11 = scmp.lt.s32.totalorder %s2239_s10, %s2239_s10 }
  0x40   :  { %929 = vmatpush1.bf16.msra.mxu1 %v2571_v36  ;;  %852 = vmatprep.subr.bf16.mxu0 %v2575_v38  ;;  %v2653_v36 = vld [vmem:[#allocation2 + $0xd0] ss:$24 sps:$4 sm:$0xff]   ;;  %v2658_v38 = vld [vmem:[#allocation2 + $0xa4] ss:$24 sps:$4 sm:$0xff]   ;;  %p2929_p10 = scmp.ne.s32.totalorder %s2239_s10, %s2928_s11  ;;  %p2934_p12 = scmp.lt.s32.totalorder %s2928_s11, %s2928_s11 }
  0x41   :  { %930 = vmatprep.subr.bf16.mxu1 %v2579_v39  ;;  %v2656_v39 = vld [vmem:[#allocation2 + $0xa0] ss:$24 sps:$4 sm:$0xff]  }
  0x42   :  { %p2935_p13 = por %p2934_p12, %p2933_p11 }
  0x43   :  { %853 = vmatpush2.bf16.msra.mxu0 %v2580_v41  ;;  %v2659_v41 = vld [vmem:[#allocation2 + $0x70] ss:$24 sps:$4 sm:$0xff]  }
  0x44   :  { %931 = vmatpush1.bf16.msra.mxu1 %v2577_v40  ;;  %854 = vmatprep.subr.bf16.mxu0 %v2581_v42  ;;  %v2661_v40 = vld [vmem:[#allocation2 + $0x74] ss:$24 sps:$4 sm:$0xff]   ;;  %v2664_v42 = vld [vmem:[#allocation2 + $0x44] ss:$24 sps:$4 sm:$0xff]   ;;  %p2936_p0 = pnand %p2935_p13, %p2929_p10 }
  0x45   :  { %932 = vmatprep.subr.bf16.mxu1 %v2585_v43  ;;  %v2662_v43 = vld [vmem:[#allocation2 + $0x40] ss:$24 sps:$4 sm:$0xff]  }
  0x47   :  { %855 = vmatpush2.bf16.msra.mxu0 %v2586_v45  ;;  %v2665_v45 = vld [vmem:[#allocation2 + $0x10] ss:$24 sps:$4 sm:$0xff]  }
  0x48   :  { %933 = vmatpush1.bf16.msra.mxu1 %v2583_v44  ;;  %856 = vmatprep.subr.bf16.mxu0 %v2587_v46  ;;  %v2667_v44 = vld [vmem:[#allocation2 + $0x14] ss:$24 sps:$4 sm:$0xff]   ;;  %v2670_v46 = vld [vmem:[#allocation2 + $0x2e4] ss:$24 sps:$4 sm:$0xff]  }
  0x49   :  { %934 = vmatprep.subr.bf16.mxu1 %v2591_v47  ;;  %v2668_v47 = vld [vmem:[#allocation2 + $0x2e0] ss:$24 sps:$4 sm:$0xff]  }
  0x4b   :  { %857 = vmatpush2.bf16.msra.mxu0 %v2592_v49  ;;  %v2671_v49 = vld [vmem:[#allocation2 + $0x2b0] ss:$24 sps:$4 sm:$0xff]  }
  0x4c   :  { %935 = vmatpush1.bf16.msra.mxu1 %v2589_v48  ;;  %858 = vmatprep.subr.bf16.mxu0 %v2593_v50  ;;  %v2673_v48 = vld [vmem:[#allocation2 + $0x2b4] ss:$24 sps:$4 sm:$0xff]   ;;  %v2676_v50 = vld [vmem:[#allocation2 + $0x284] ss:$24 sps:$4 sm:$0xff]  }
  0x4d   :  { %936 = vmatprep.subr.bf16.mxu1 %v2597_v52  ;;  %v2677_v52 = vld [vmem:[#allocation2 + $0x250] ss:$24 sps:$4 sm:$0xff]  }
  0x4f   :  { %859 = vmatpush2.bf16.msra.mxu0 %v2598_v54  ;;  %v2683_v54 = vld [vmem:[#allocation2 + $0x220] ss:$24 sps:$4 sm:$0xff]  }
  0x50   :  { %937 = vmatpush2.bf16.msra.mxu1 %v2595_v53  ;;  %860 = vmatprep.subr.bf16.mxu0 %v2599_v55  ;;  %v2685_v53 = vld [vmem:[#allocation2 + $0x224] ss:$24 sps:$4 sm:$0xff]   ;;  %v2691_v55 = vld [vmem:[#allocation2 + $0x1f4] ss:$24 sps:$4 sm:$0xff]  }
  0x51   :  { %938 = vmatprep.subr.bf16.mxu1 %v2603_v56  ;;  %v2689_v56 = vld [vmem:[#allocation2 + $0x1f0] ss:$24 sps:$4 sm:$0xff]  }
  0x53   :  { %861 = vmatpush2.bf16.msra.mxu0 %v2604_v58  ;;  %v2695_v58 = vld [vmem:[#allocation2 + $0x1c0] ss:$24 sps:$4 sm:$0xff]  }
  0x54   :  { %939 = vmatpush2.bf16.msra.mxu1 %v2601_v57  ;;  %862 = vmatprep.subr.bf16.mxu0 %v2605_v59  ;;  %v2697_v57 = vld [vmem:[#allocation2 + $0x1c4] ss:$24 sps:$4 sm:$0xff]   ;;  %v2703_v59 = vld [vmem:[#allocation2 + $0x194] ss:$24 sps:$4 sm:$0xff]  }
  0x55   :  { %940 = vmatprep.subr.bf16.mxu1 %v2609_v60  ;;  %v2701_v60 = vld [vmem:[#allocation2 + $0x190] ss:$24 sps:$4 sm:$0xff]  }
  0x57   :  { %863 = vmatpush2.bf16.msra.mxu0 %v2610_v62 }
  0x58   :  { %941 = vmatpush2.bf16.msra.mxu1 %v2607_v61  ;;  %864 = vmatprep.subr.bf16.mxu0 %v2611_v63  ;;  %v185_v61 = vlaneseq }
  0x59   :  { %942 = vmatprep.subr.bf16.mxu1 %v2615_v1  ;;  %v3050_v1 = vld [vmem:[%s3200_s3] sm:$0x3f] }
  0x5a   :  { %v3044_v62 = vshrl.u32 %v185_v61, 7 }
  0x5b   :  { %865 = vmatpush2.bf16.msra.mxu0 %v2616_v3 }
  0x5c   :  { %943 = vmatpush2.bf16.msra.mxu1 %v2613_v2  ;;  %971 = vmatprep.subr.bf16.mxu0 %v2625_v5  ;;  %v187_v63 = vsub.s32 0, %v3044_v62  ;;  %v191_v2 = vsub.s32 1, %v3044_v62 }
  0x5d   :  { %944 = vmatprep.subr.bf16.mxu1 %v2622_v4 }
  0x5e   :  { %867 = vmatmul.mubr.bf16.vlgmr.msra.gmra.mxu0 %v3031_v6  ;;  %v188_v4 = vrot.slane %v3050_v1, %v187_v63  ;;  %v192_v5 = vrot.slane %v3050_v1, %v191_v2 }
  0x5f   :  { %972 = vmatpush1.bf16.msra.mxu0 %v2623_v8  ;;  %995 = vmatprep.mubr.bf16.mxu0 %v2960_v0 }
  0x60   :  { %945 = vmatpush2.bf16.msra.mxu1 %v2620_v7  ;;  %973 = vmatprep.subr.bf16.mxu0 %v2631_v10 }
  0x61   :  { %946 = vmatprep.subr.bf16.mxu1 %v2628_v9 }
  0x63   :  { %974 = vmatpush1.bf16.msra.mxu0 %v2629_v12 }
  0x64   :  { %947 = vmatpush2.bf16.msra.mxu1 %v2626_v11  ;;  %975 = vmatprep.subr.bf16.mxu0 %v2637_v14  ;;  %v2710_v14 = vld [vmem:[#allocation5 + $0x170] ss:$8 sps:$4 sm:$0xff]  }
  0x65   :  { %948 = vmatprep.subr.bf16.mxu1 %v2634_v13 }
  0x67   :  { %976 = vmatpush1.bf16.msra.mxu0 %v2635_v16 }
  0x68   :  { %949 = vmatpush2.bf16.msra.mxu1 %v2632_v15  ;;  %977 = vmatprep.subr.bf16.mxu0 %v2643_v18  ;;  %v2712_v15 = vld [vmem:[#allocation5 + $0x174] ss:$8 sps:$4 sm:$0xff]  }
  0x69   :  { %950 = vmatprep.subr.bf16.mxu1 %v2640_v17 }
  0x6b   :  { %978 = vmatpush1.bf16.msra.mxu0 %v2641_v21 }
  0x6c   :  { %951 = vmatpush2.bf16.msra.mxu1 %v2638_v20  ;;  %1006 = vmatprep.subr.bf16.mxu0 %v2646_v22 }
  0x6d   :  { %1057 = vmatprep.subr.bf16.mxu1 %v2682_v23 }
  0x6e   :  { %2372 = vmatmul.mubr.msk.bf16.vlgmr.msra.gmra.mxu0 %vm830_vm0, %v3017_v19 }
  0x6f   :  { %953 = vmatmul.mubr.bf16.vlgmr.msra.gmra.mxu1 %v3031_v6  ;;  %1007 = vmatpush1.bf16.msra.mxu0 %v2644_v24 }
  0x70   :  { %1058 = vmatpush1.bf16.msra.mxu1 %v2680_v26  ;;  %1008 = vmatprep.subr.bf16.mxu0 %v2649_v25  ;;  %v195_v26 = vsub.s32 2, %v3044_v62 }
  0x71   :  { %1059 = vmatprep.subr.bf16.mxu1 %v2688_v27  ;;  %1081 = vmatprep.mubr.bf16.mxu1 %v2960_v0  ;;  %v2716_v27 = vld [vmem:[#allocation5 + $0x160] ss:$8 sps:$4 sm:$0xff]  }
  0x72   :  { %1038 = vmatprep.mubr.bf16.mxu0 %v3024_v51  ;;  %v2679_v51 = vld [vmem:[#allocation2 + $0x254] ss:$24 sps:$4 sm:$0xff]  }
  0x73   :  { %1009 = vmatpush1.bf16.msra.mxu0 %v2647_v28  ;;  %v2718_v28 = vld [vmem:[#allocation5 + $0x164] ss:$8 sps:$4 sm:$0xff]  }
  0x74   :  { %1060 = vmatpush1.bf16.msra.mxu1 %v2686_v29  ;;  %1010 = vmatprep.subr.bf16.mxu0 %v2652_v30 }
  0x75   :  { %1061 = vmatprep.subr.bf16.mxu1 %v2694_v31 }
  0x77   :  { %1011 = vmatpush1.bf16.msra.mxu0 %v2650_v32 }
  0x78   :  { %1062 = vmatpush1.bf16.msra.mxu1 %v2692_v33  ;;  %1012 = vmatprep.subr.bf16.mxu0 %v2655_v34  ;;  %v199_v33 = vsub.s32 3, %v3044_v62 }
  0x79   :  { %1063 = vmatprep.subr.bf16.mxu1 %v2700_v35 }
  0x7b   :  { %1013 = vmatpush1.bf16.msra.mxu0 %v2653_v36 }
  0x7c   :  { %1064 = vmatpush1.bf16.msra.mxu1 %v2698_v37  ;;  %1014 = vmatprep.subr.bf16.mxu0 %v2658_v38  ;;  %v196_v38 = vrot.slane %v3050_v1, %v195_v26 }
  0x7f   :  { %2373 = vmatmul.mubr.msk.bf16.vlgmr.msra.gmra.mxu1 %vm830_vm0, %v3017_v19  ;;  %1015 = vmatpush1.bf16.msra.mxu0 %v2656_v39  ;;  %v2674_v19 = vld [vmem:[#allocation2 + $0x280] ss:$24 sps:$4 sm:$0xff]  }
  0x80   :  { %1243 = vmatprep.mubr.bf16.mxu1 %v2960_v0  ;;  %1016 = vmatprep.subr.bf16.mxu0 %v2661_v40  ;;  %v2722_v39 = vld [vmem:[#allocation5 + $0x150] ss:$8 sps:$4 sm:$0xff]   ;;  %v2724_v40 = vld [vmem:[#allocation5 + $0x154] ss:$8 sps:$4 sm:$0xff]  }
  0x83   :  { %1017 = vmatpush1.bf16.msra.mxu0 %v2659_v41 }
  0x84   :  { %1018 = vmatprep.subr.bf16.mxu0 %v2664_v42 }
  0x87   :  { %1019 = vmatpush1.bf16.msra.mxu0 %v2662_v43 }
  0x88   :  { %1020 = vmatprep.subr.bf16.mxu0 %v2667_v44 }
  0x8b   :  { %1021 = vmatpush1.bf16.msra.mxu0 %v2665_v45 }
  0x8c   :  { %1022 = vmatprep.subr.bf16.mxu0 %v2670_v46 }
  0x8f   :  { %1023 = vmatpush2.bf16.msra.mxu0 %v2668_v47 }
  0x90   :  { %1024 = vmatprep.subr.bf16.mxu0 %v2673_v48  ;;  %v200_v48 = vrot.slane %v3050_v1, %v199_v33 }
  0x93   :  { %1025 = vmatpush2.bf16.msra.mxu0 %v2671_v49 }
  0x94   :  { %1026 = vmatprep.subr.bf16.mxu0 %v2676_v50 }
  0x97   :  { %1027 = vmatpush2.bf16.msra.mxu0 %v2674_v19  ;;  %v2728_v19 = vld [vmem:[#allocation5 + $0x140] ss:$8 sps:$4 sm:$0xff]  }
  0x98   :  { %1028 = vmatprep.subr.bf16.mxu0 %v2679_v51  ;;  %v2730_v51 = vld [vmem:[#allocation5 + $0x144] ss:$8 sps:$4 sm:$0xff]  }
  0x9b   :  { %1029 = vmatpush2.bf16.msra.mxu0 %v2677_v52 }
  0x9c   :  { %1030 = vmatprep.subr.bf16.mxu0 %v2685_v53 }
  0x9f   :  { %1031 = vmatpush2.bf16.msra.mxu0 %v2683_v54 }
  0xa0   :  { %1032 = vmatprep.subr.bf16.mxu0 %v2691_v55 }
  0xa3   :  { %1033 = vmatpush2.bf16.msra.mxu0 %v2689_v56 }
  0xa4   :  { %1034 = vmatprep.subr.bf16.mxu0 %v2697_v57 }
  0xa7   :  { %1035 = vmatpush2.bf16.msra.mxu0 %v2695_v58 }
  0xa8   :  { %1036 = vmatprep.subr.bf16.mxu0 %v2703_v59 }
  0xab   :  { %1037 = vmatpush2.bf16.msra.mxu0 %v2701_v60 }
  0xac   :  { %1969 = vmatprep.subr.bf16.mxu0 %v2712_v15  ;;  %v2740_v15 = vld [vmem:[#allocation5 + $0x120] ss:$8 sps:$4 sm:$0xff]  }
  0xae   :  { %1039 = vmatmul.mubr.bf16.vlgmr.msra.gmra.mxu0 %v3031_v6 }
  0xaf   :  { %1970 = vmatpush1.bf16.msra.mxu0 %v2710_v14 }
  0xb0   :  { %1971 = vmatprep.subr.bf16.mxu0 %v2718_v28  ;;  %v2746_v28 = vld [vmem:[#allocation5 + $0x110] ss:$8 sps:$4 sm:$0xff]  }
  0xb3   :  { %1972 = vmatpush1.bf16.msra.mxu0 %v2716_v27 }
  0xb4   :  { %1973 = vmatprep.subr.bf16.mxu0 %v2724_v40 }
  0xb7   :  { %1974 = vmatpush1.bf16.msra.mxu0 %v2722_v39 }
  0xb8   :  { %1975 = vmatprep.subr.bf16.mxu0 %v2730_v51 }
  0xbb   :  { %1976 = vmatpush1.bf16.msra.mxu0 %v2728_v19 }
  0xef   :  { %v911_v3 = vpop.f32.mrf.mxu1 }
  0xf1   :  { %v913_v6 = vpop.f32.mrf.mxu1 }
  0xf3   :  { %v915_v12 = vpop.f32.mrf.mxu1 }
  0xf5   :  { %v917_v25 = vpop.f32.mrf.mxu1 }
 0x11e   :  { %v868_v7 = vpop.f32.mrf.mxu0 }
 0x11f   :  { %v869_v8 = vadd.f32 %v868_v7, %v188_v4 }
 0x120   :  { %v870_v9 = vpop.f32.mrf.mxu0 }
 0x121   :  { %v3059_v10 = vadd.f32 %v911_v3, %v869_v8  ;;  %v871_v11 = vadd.f32 %v870_v9, %v192_v5  ;;  %v2734_v3 = vld [vmem:[#allocation5 + $0x130] ss:$8 sps:$4 sm:$0xff]  }
 0x122   :  { %v872_v13 = vpop.f32.mrf.mxu0 }
 0x123   :  { %v1092_v16 = vmul.f32 %v3059_v10, %v3059_v10  ;;  %v3063_v17 = vadd.f32 %v913_v6, %v871_v11  ;;  %v873_v18 = vadd.f32 %v872_v13, %v188_v4  ;;  %v2736_v4 = vld [vmem:[#allocation5 + $0x134] ss:$8 sps:$4 sm:$0xff]  }
 0x124   :  { %v874_v20 = vpop.f32.mrf.mxu0  ;;  %1977 = vmatprep.subr.bf16.mxu0 %v2736_v4 }
 0x125   :  { %v1104_v21 = vmul.f32 %v1092_v16, %v3059_v10  ;;  %v1093_v22 = vmul.f32 %v3063_v17, %v3063_v17  ;;  %v3068_v23 = vadd.f32 %v915_v12, %v873_v18  ;;  %v875_v24 = vadd.f32 %v874_v20, %v192_v5  ;;  %1978 = vmatpush1.bf16.msra.mxu0 %v2734_v3  ;;  %v2742_v16 = vld [vmem:[#allocation5 + $0x124] ss:$8 sps:$4 sm:$0xff]  }
 0x126   :  { %1979 = vmatprep.subr.bf16.mxu0 %v2742_v16  ;;  %v2766_v3 = vld [vmem:[#allocation5 + $0x1e4] ss:$8 sps:$4 sm:$0xff]  }
 0x127   :  { %v1116_v29 = vmul.f32 0.044715, %v1104_v21  ;;  %v1105_v30 = vmul.f32 %v1093_v22, %v3063_v17  ;;  %v1098_v31 = vmul.f32 %v3068_v23, %v3068_v23  ;;  %v3074_v32 = vadd.f32 %v917_v25, %v875_v24 }
 0x129   :  { %v1128_v34 = vadd.f32 %v1116_v29, %v3059_v10  ;;  %v1117_v35 = vmul.f32 0.044715, %v1105_v30  ;;  %v1110_v36 = vmul.f32 %v1098_v31, %v3068_v23  ;;  %v1099_v37 = vmul.f32 %v3074_v32, %v3074_v32  ;;  %1980 = vmatpush1.bf16.msra.mxu0 %v2740_v15  ;;  %v2748_v29 = vld [vmem:[#allocation5 + $0x114] ss:$8 sps:$4 sm:$0xff]  }
 0x12a   :  { %1981 = vmatprep.subr.bf16.mxu0 %v2748_v29 }
 0x12b   :  { %v1140_v41 = vmul.f32 0.7978846, %v1128_v34  ;;  %v1129_v42 = vadd.f32 %v1117_v35, %v3063_v17  ;;  %v1122_v43 = vmul.f32 0.044715, %v1110_v36  ;;  %v1111_v44 = vmul.f32 %v1099_v37, %v3074_v32 }
 0x12d   :  { %v1141_v45 = vmul.f32 0.7978846, %v1129_v42  ;;  %v1134_v46 = vadd.f32 %v1122_v43, %v3068_v23  ;;  %v1123_v47 = vmul.f32 0.044715, %v1111_v44  ;;  %2864 = vtanh.f32 %v1140_v41  ;;  %1982 = vmatpush1.bf16.msra.mxu0 %v2746_v28  ;;  %v2752_v43 = vld [vmem:[#allocation5 + $0x100] ss:$8 sps:$4 sm:$0xff]  }
 0x12e   :  { %v997_v50 = vpop.f32.mrf.mxu0  ;;  %v2754_v44 = vld [vmem:[#allocation5 + $0x104] ss:$8 sps:$4 sm:$0xff]  }
 0x12f   :  { %v954_v49 = vpop.f32.mrf.mxu1  ;;  %2866 = vtanh.f32 %v1141_v45  ;;  %v1146_v52 = vmul.f32 0.7978846, %v1134_v46  ;;  %v1135_v53 = vadd.f32 %v1123_v47, %v3074_v32  ;;  %1983 = vmatprep.subr.bf16.mxu0 %v2754_v44 }
 0x130   :  { %v955_v54 = vadd.f32 %v954_v49, %v196_v38  ;;  %v999_v56 = vpop.f32.mrf.mxu0 }
 0x131   :  { %v956_v55 = vpop.f32.mrf.mxu1  ;;  %2868 = vtanh.f32 %v1146_v52  ;;  %v1147_v57 = vmul.f32 0.7978846, %v1135_v53  ;;  %1984 = vmatpush1.bf16.msra.mxu0 %v2752_v43  ;;  %v2758_v53 = vld [vmem:[#allocation5 + $0x1f0] ss:$8 sps:$4 sm:$0xff]  }
 0x132   :  { %v3087_v58 = vadd.f32 %v997_v50, %v955_v54  ;;  %v957_v59 = vadd.f32 %v956_v55, %v200_v48  ;;  %v1001_v61 = vpop.f32.mrf.mxu0  ;;  %v2760_v54 = vld [vmem:[#allocation5 + $0x1f4] ss:$8 sps:$4 sm:$0xff]  }
 0x133   :  { %v958_v60 = vpop.f32.mrf.mxu1  ;;  %2870 = vtanh.f32 %v1147_v57  ;;  %1985 = vmatprep.subr.bf16.mxu0 %v2760_v54 }
 0x134   :  { %v1094_v5 = vmul.f32 %v3087_v58, %v3087_v58  ;;  %v3091_v6 = vadd.f32 %v999_v56, %v957_v59  ;;  %v959_v7 = vadd.f32 %v958_v60, %v196_v38  ;;  %v1003_v14 = vpop.f32.mrf.mxu0 }
 0x135   :  { %v960_v8 = vpop.f32.mrf.mxu1  ;;  %1986 = vmatpush2.bf16.msra.mxu0 %v2758_v53 }
 0x136   :  { %v1106_v9 = vmul.f32 %v1094_v5, %v3087_v58  ;;  %v1095_v11 = vmul.f32 %v3091_v6, %v3091_v6  ;;  %v3096_v12 = vadd.f32 %v1001_v61, %v959_v7  ;;  %v961_v13 = vadd.f32 %v960_v8, %v200_v48  ;;  %v2764_v61 = vld [vmem:[#allocation5 + $0x1e0] ss:$8 sps:$4 sm:$0xff]   ;;  %1987 = vmatprep.subr.bf16.mxu0 %v2766_v3 }
 0x137   :  { %v3118_v7 = vld [vmem:[%s3198_s1] sm:$0x1] }
 0x138   :  { %v1118_v18 = vmul.f32 0.044715, %v1106_v9  ;;  %v1107_v20 = vmul.f32 %v1095_v11, %v3091_v6  ;;  %v1100_v21 = vmul.f32 %v3096_v12, %v3096_v12  ;;  %v3101_v22 = vadd.f32 %v1003_v14, %v961_v13  ;;  %v2776_v13 = vld [vmem:[#allocation5 + $0x1c0] ss:$8 sps:$4 sm:$0xff]   ;;  %v2778_v14 = vld [vmem:[#allocation5 + $0x1c4] ss:$8 sps:$4 sm:$0xff]  }
 0x139   :  { %1988 = vmatpush2.bf16.msra.mxu0 %v2764_v61 }
 0x13a   :  { %v1130_v24 = vadd.f32 %v1118_v18, %v3087_v58  ;;  %v1119_v25 = vmul.f32 0.044715, %v1107_v20  ;;  %v1112_v26 = vmul.f32 %v1100_v21, %v3096_v12  ;;  %v1101_v27 = vmul.f32 %v3101_v22, %v3101_v22  ;;  %v2865_v30 = vpop.eup %2864 }
 0x13b   :  { %v1164_v42 = vadd.f32 1.0, %v2865_v30 }
 0x13c   :  { %v1142_v31 = vmul.f32 0.7978846, %v1130_v24  ;;  %v1131_v33 = vadd.f32 %v1119_v25, %v3091_v6  ;;  %v1124_v34 = vmul.f32 0.044715, %v1112_v26  ;;  %v1113_v35 = vmul.f32 %v1101_v27, %v3101_v22  ;;  %v2867_v36 = vpop.eup %2866  ;;  %v2782_v25 = vld [vmem:[#allocation5 + $0x1b0] ss:$8 sps:$4 sm:$0xff]  }
 0x13d   :  { %v1165_v41 = vadd.f32 1.0, %v2867_v36  ;;  %v1176_v52 = vmul.f32 0.5, %v1164_v42  ;;  %v2784_v26 = vld [vmem:[#allocation5 + $0x1b4] ss:$8 sps:$4 sm:$0xff]  }
 0x13e   :  { %v1143_v37 = vmul.f32 0.7978846, %v1131_v33  ;;  %v1136_v38 = vadd.f32 %v1124_v34, %v3096_v12  ;;  %v1125_v39 = vmul.f32 0.044715, %v1113_v35  ;;  %v2869_v40 = vpop.eup %2868  ;;  %2872 = vtanh.f32 %v1142_v31 }
 0x13f   :  { %v1170_v47 = vadd.f32 1.0, %v2869_v40  ;;  %v1177_v49 = vmul.f32 0.5, %v1165_v41  ;;  %v1188_v60 = vmul.f32 %v1176_v52, %v3059_v10  ;;  %v203_v35 = vsub.s32 4, %v3044_v62  ;;  %v1083_v36 = vpop.f32.mrf.mxu1 }
 0x140   :  { %2874 = vtanh.f32 %v1143_v37  ;;  %v1148_v45 = vmul.f32 0.7978846, %v1136_v38  ;;  %v1137_v46 = vadd.f32 %v1125_v39, %v3101_v22  ;;  %v2871_v48 = vpop.eup %2870 }
 0x141   :  { %v1171_v19 = vadd.f32 1.0, %v2871_v48  ;;  %v1182_v51 = vmul.f32 0.5, %v1170_v47  ;;  %v1189_v57 = vmul.f32 %v1177_v49, %v3063_v17  ;;  %v2770_v17 = vld [vmem:[#allocation5 + $0x1d0] ss:$8 sps:$4 sm:$0xff]   ;;  %v1085_v37 = vpop.f32.mrf.mxu1 }
 0x142   :  { %2876 = vtanh.f32 %v1148_v45  ;;  %v1149_v50 = vmul.f32 0.7978846, %v1137_v46 }
 0x143   :  { %v1183_v55 = vmul.f32 0.5, %v1171_v19  ;;  %v1194_v56 = vmul.f32 %v1182_v51, %v3068_v23  ;;  %v2772_v23 = vld [vmem:[#allocation5 + $0x1d4] ss:$8 sps:$4 sm:$0xff]   ;;  %v1087_v42 = vpop.f32.mrf.mxu1 }
 0x144   :  { %2878 = vtanh.f32 %v1149_v50  ;;  %1989 = vmatprep.subr.bf16.mxu0 %v2772_v23 }
 0x145   :  { %v1195_v59 = vmul.f32 %v1183_v55, %v3074_v32  ;;  %v1201_v5 = vpack.c.bf16 %v1194_v56, %v1188_v60  ;;  %1990 = vmatpush2.bf16.msra.mxu0 %v2770_v17  ;;  %v1089_v19 = vpop.f32.mrf.mxu1 }
 0x146   :  { %1991 = vmatprep.subr.bf16.mxu0 %v2778_v14 }
 0x147   :  { %v1202_v4 = vpack.c.bf16 %v1195_v59, %v1189_v57 }
 0x149   :  { %1225 = vmatprep.subr.bf16.mxu1 %v1202_v4  ;;  %1992 = vmatpush2.bf16.msra.mxu0 %v2776_v13 }
 0x14a   :  { %1226 = vmatpush1.bf16.msra.mxu1 %v1201_v5  ;;  %1993 = vmatprep.subr.bf16.mxu0 %v2784_v26 }
 0x14b   :  { %v2873_v32 = vpop.eup %2872 }
 0x14c   :  { %v1166_v11 = vadd.f32 1.0, %v2873_v32 }
 0x14d   :  { %v2875_v8 = vpop.eup %2874  ;;  %2374 = vmatmul.mubr.msk.bf16.vlgmr.msra.gmra.mxu1 %vm1207_vm1, %v3118_v7  ;;  %1994 = vmatpush2.bf16.msra.mxu0 %v2782_v25 }
 0x14e   :  { %v1167_v10 = vadd.f32 1.0, %v2875_v8  ;;  %1284 = vmatprep.mubr.bf16.mxu1 %v2960_v0  ;;  %v1178_v24 = vmul.f32 0.5, %v1166_v11 }
 0x14f   :  { %v2877_v9 = vpop.eup %2876 }
 0x150   :  { %v1172_v15 = vadd.f32 1.0, %v2877_v9  ;;  %v1179_v21 = vmul.f32 0.5, %v1167_v10  ;;  %v1190_v31 = vmul.f32 %v1178_v24, %v3087_v58 }
 0x151   :  { %v2879_v16 = vpop.eup %2878 }
 0x152   :  { %v1184_v18 = vmul.f32 0.5, %v1172_v15  ;;  %v1173_v20 = vadd.f32 1.0, %v2879_v16  ;;  %v1191_v29 = vmul.f32 %v1179_v21, %v3091_v6  ;;  %v204_v6 = vrot.slane %v3050_v1, %v203_v35 }
 0x154   :  { %v1185_v27 = vmul.f32 0.5, %v1173_v20  ;;  %v1196_v28 = vmul.f32 %v1184_v18, %v3096_v12  ;;  %v207_v12 = vsub.s32 5, %v3044_v62  ;;  %v2788_v18 = vld [vmem:[#allocation5 + $0x1a0] ss:$8 sps:$4 sm:$0xff]   ;;  %v2790_v20 = vld [vmem:[#allocation5 + $0x1a4] ss:$8 sps:$4 sm:$0xff]  }
 0x155   :  { %1995 = vmatprep.subr.bf16.mxu0 %v2790_v20  ;;  %v2809_v20 = vld [vmem:[#allocation5 + $0x240] ss:$8 sps:$4 sm:$0xff]  }
 0x156   :  { %v1197_v30 = vmul.f32 %v1185_v27, %v3101_v22  ;;  %v1203_v34 = vpack.c.bf16 %v1196_v28, %v1190_v31  ;;  %v208_v22 = vrot.slane %v3050_v1, %v207_v12  ;;  %1996 = vmatpush2.bf16.msra.mxu0 %v2788_v18  ;;  %v2794_v28 = vld [vmem:[#allocation5 + $0x190] ss:$8 sps:$4 sm:$0xff]   ;;  %v2706_v12 = vld [vmem:[#allocation5 + $0x74] ss:$8 sps:$4 sm:$0xff]   ;;  %v2811_v18 = vld [vmem:[#allocation5 + $0x244] ss:$8 sps:$4 sm:$0xff]  }
 0x157   :  { %v2473_v62 = vld [vmem:[%s3204_s7] ss:$0 sm:$0xff] }
 0x158   :  { %v1204_v33 = vpack.c.bf16 %v1197_v30, %v1191_v29  ;;  %v2796_v29 = vld [vmem:[#allocation5 + $0x194] ss:$8 sps:$4 sm:$0xff]  }
 0x159   :  { %1997 = vmatprep.subr.bf16.mxu0 %v2796_v29  ;;  %v2817_v29 = vld [vmem:[#allocation5 + $0x224] ss:$8 sps:$4 sm:$0xff]  }
 0x15a   :  { %1266 = vmatprep.subr.bf16.mxu1 %v1204_v33  ;;  %1998 = vmatpush2.bf16.msra.mxu0 %v2794_v28  ;;  %v2812_v28 = vld [vmem:[#allocation5 + $0x230] ss:$8 sps:$4 sm:$0xff]  }
 0x15b   :  { %1267 = vmatpush1.bf16.msra.mxu1 %v1203_v34 }
 0x15e   :  { %2375 = vmatmul.mubr.msk.bf16.vlgmr.msra.gmra.mxu1 %vm1207_vm1, %v3118_v7 }
 0x15f   :  { %1325 = vmatprep.mubr.bf16.mxu1 %v2960_v0 }
 0x16e   :  { %v1040_v58 = vpop.f32.mrf.mxu0 }
 0x16f   :  { %v1041_v38 = vadd.f32 %v1040_v58, %v204_v6  ;;  %v2799_v58 = vld [vmem:[#allocation5 + $0x184] ss:$8 sps:$4 sm:$0xff]  }
 0x170   :  { %v1042_v39 = vpop.f32.mrf.mxu0  ;;  %1999 = vmatprep.subr.bf16.mxu0 %v2799_v58  ;;  %v2827_v58 = vld [vmem:[#allocation5 + $0x2e0] ss:$8 sps:$4 sm:$0xff]  }
 0x171   :  { %v1084_v40 = vadd.f32 %v1083_v36, %v1041_v38  ;;  %v1043_v41 = vadd.f32 %v1042_v39, %v208_v22  ;;  %v2715_v38 = vld [vmem:[#allocation5 + $0x54] ss:$8 sps:$4 sm:$0xff]   ;;  %v2797_v39 = vld [vmem:[#allocation5 + $0x180] ss:$8 sps:$4 sm:$0xff]  }
 0x172   :  { %v1044_v43 = vpop.f32.mrf.mxu0  ;;  %2000 = vmatpush2.bf16.msra.mxu0 %v2797_v39  ;;  %v2830_v39 = vld [vmem:[#allocation5 + $0x2d0] ss:$8 sps:$4 sm:$0xff]  }
 0x173   :  { %v1096_v44 = vmul.f32 %v1084_v40, %v1084_v40  ;;  %v1086_v45 = vadd.f32 %v1085_v37, %v1043_v41  ;;  %v1045_v0 = vadd.f32 %v1044_v43, %v204_v6  ;;  %v2704_v6 = vld [vmem:[#allocation5 + $0x70] ss:$8 sps:$4 sm:$0xff]   ;;  %v2707_v37 = vld [vmem:[#allocation5 + $0x60] ss:$8 sps:$4 sm:$0xff]   ;;  %v2721_v41 = vld [vmem:[#allocation5 + $0x44] ss:$8 sps:$4 sm:$0xff]  }
 0x174   :  { %v1046_v46 = vpop.f32.mrf.mxu0  ;;  %v2727_v43 = vld [vmem:[#allocation5 + $0x34] ss:$8 sps:$4 sm:$0xff]  }
 0x175   :  { %v1108_v47 = vmul.f32 %v1096_v44, %v1084_v40  ;;  %v1097_v48 = vmul.f32 %v1086_v45, %v1086_v45  ;;  %v1088_v49 = vadd.f32 %v1087_v42, %v1045_v0  ;;  %v1047_v50 = vadd.f32 %v1046_v46, %v208_v22  ;;  %v2709_v22 = vld [vmem:[#allocation5 + $0x64] ss:$8 sps:$4 sm:$0xff]   ;;  %v2719_v42 = vld [vmem:[#allocation5 + $0x40] ss:$8 sps:$4 sm:$0xff]   ;;  %v2725_v44 = vld [vmem:[#allocation5 + $0x30] ss:$8 sps:$4 sm:$0xff]  }
 0x176   :  { %v2739_v0 = vld [vmem:[#allocation5 + $0x14] ss:$8 sps:$4 sm:$0xff]   ;;  %v2737_v46 = vld [vmem:[#allocation5 + $0x10] ss:$8 sps:$4 sm:$0xff]  }
 0x177   :  { %v1120_v51 = vmul.f32 0.044715, %v1108_v47  ;;  %v1109_v52 = vmul.f32 %v1097_v48, %v1086_v45  ;;  %v1102_v1 = vmul.f32 %v1088_v49, %v1088_v49  ;;  %v1090_v53 = vadd.f32 %v1089_v19, %v1047_v50  ;;  %v2745_v47 = vld [vmem:[#allocation5 + $0x4] ss:$8 sps:$4 sm:$0xff]   ;;  %v2743_v48 = vld [vmem:[#allocation5] ss:$8 sps:$4 sm:$0xff]  }
 0x178   :  { %v2749_v50 = vld [vmem:[#allocation5 + $0xf0] ss:$8 sps:$4 sm:$0xff]   ;;  %v2757_v19 = vld [vmem:[#allocation5 + $0xe4] ss:$8 sps:$4 sm:$0xff]  }
 0x179   :  { %v1132_v54 = vadd.f32 %v1120_v51, %v1084_v40  ;;  %v1121_v55 = vmul.f32 0.044715, %v1109_v52  ;;  %v1114_v56 = vmul.f32 %v1102_v1, %v1088_v49  ;;  %v1103_v57 = vmul.f32 %v1090_v53, %v1090_v53  ;;  %v2755_v51 = vld [vmem:[#allocation5 + $0xe0] ss:$8 sps:$4 sm:$0xff]   ;;  %v2763_v52 = vld [vmem:[#allocation5 + $0xd4] ss:$8 sps:$4 sm:$0xff]  }
 0x17a   :  { %v2761_v1 = vld [vmem:[#allocation5 + $0xd0] ss:$8 sps:$4 sm:$0xff]  }
 0x17b   :  { %v1144_v59 = vmul.f32 0.7978846, %v1132_v54  ;;  %v1133_v60 = vadd.f32 %v1121_v55, %v1086_v45  ;;  %v1126_v61 = vmul.f32 0.044715, %v1114_v56  ;;  %v1115_v3 = vmul.f32 %v1103_v57, %v1090_v53  ;;  %v2767_v54 = vld [vmem:[#allocation5 + $0xc0] ss:$8 sps:$4 sm:$0xff]  }
 0x17c   :  { %v2775_v55 = vld [vmem:[#allocation5 + $0xb4] ss:$8 sps:$4 sm:$0xff]   ;;  %v2773_v56 = vld [vmem:[#allocation5 + $0xb0] ss:$8 sps:$4 sm:$0xff]   ;;  %v2781_v57 = vld [vmem:[#allocation5 + $0xa4] ss:$8 sps:$4 sm:$0xff]  }
 0x17d   :  { %v1145_v4 = vmul.f32 0.7978846, %v1133_v60  ;;  %v1138_v5 = vadd.f32 %v1126_v61, %v1088_v49  ;;  %v1127_v17 = vmul.f32 0.044715, %v1115_v3  ;;  %2880 = vtanh.f32 %v1144_v59  ;;  %v2779_v59 = vld [vmem:[#allocation5 + $0xa0] ss:$8 sps:$4 sm:$0xff]  }
 0x17e   :  { %v2787_v60 = vld [vmem:[#allocation5 + $0x94] ss:$8 sps:$4 sm:$0xff]   ;;  %v2785_v61 = vld [vmem:[#allocation5 + $0x90] ss:$8 sps:$4 sm:$0xff]   ;;  %v2793_v3 = vld [vmem:[#allocation5 + $0x84] ss:$8 sps:$4 sm:$0xff]  }
 0x17f   :  { %2882 = vtanh.f32 %v1145_v4  ;;  %v1150_v23 = vmul.f32 0.7978846, %v1138_v5  ;;  %v1139_v32 = vadd.f32 %v1127_v17, %v1090_v53  ;;  %v2791_v4 = vld [vmem:[#allocation5 + $0x80] ss:$8 sps:$4 sm:$0xff]   ;;  %v2802_v5 = vld [vmem:[#allocation5 + $0x274] ss:$8 sps:$4 sm:$0xff]  }
 0x181   :  { %2884 = vtanh.f32 %v1150_v23  ;;  %v1151_v8 = vmul.f32 0.7978846, %v1139_v32 }
 0x183   :  { %2886 = vtanh.f32 %v1151_v8 }
 0x18a   :  { %v2881_v10 = vpop.eup %2880 }
 0x18b   :  { %v1168_v14 = vadd.f32 1.0, %v2881_v10  ;;  %v2800_v10 = vld [vmem:[#allocation5 + $0x270] ss:$8 sps:$4 sm:$0xff]  }
 0x18c   :  { %v2883_v9 = vpop.eup %2882 }
 0x18d   :  { %v1169_v11 = vadd.f32 1.0, %v2883_v9  ;;  %v1180_v26 = vmul.f32 0.5, %v1168_v14  ;;  %v2803_v14 = vld [vmem:[#allocation5 + $0x260] ss:$8 sps:$4 sm:$0xff]  }
 0x18e   :  { %v2885_v13 = vpop.eup %2884 }
 0x18f   :  { %v1174_v15 = vadd.f32 1.0, %v2885_v13  ;;  %v1181_v24 = vmul.f32 0.5, %v1169_v11  ;;  %v1192_v34 = vmul.f32 %v1180_v26, %v1084_v40  ;;  %v2713_v40 = vld [vmem:[#allocation5 + $0x50] ss:$8 sps:$4 sm:$0xff]   ;;  %v2805_v11 = vld [vmem:[#allocation5 + $0x264] ss:$8 sps:$4 sm:$0xff]  }
 0x190   :  { %v2887_v16 = vpop.eup %2886 }
 0x191   :  { %v1175_v21 = vadd.f32 1.0, %v2887_v16  ;;  %v1186_v25 = vmul.f32 0.5, %v1174_v15  ;;  %v1193_v31 = vmul.f32 %v1181_v24, %v1086_v45  ;;  %v2731_v45 = vld [vmem:[#allocation5 + $0x20] ss:$8 sps:$4 sm:$0xff]   ;;  %v2808_v15 = vld [vmem:[#allocation5 + $0x254] ss:$8 sps:$4 sm:$0xff]  }
 0x192   :  { %v2806_v16 = vld [vmem:[#allocation5 + $0x250] ss:$8 sps:$4 sm:$0xff]   ;;  %v2814_v24 = vld [vmem:[#allocation5 + $0x234] ss:$8 sps:$4 sm:$0xff]  }
 0x193   :  { %v1187_v27 = vmul.f32 0.5, %v1175_v21  ;;  %v1198_v30 = vmul.f32 %v1186_v25, %v1088_v49  ;;  %v2751_v49 = vld [vmem:[#allocation5 + $0xf4] ss:$8 sps:$4 sm:$0xff]  }
 0x195   :  { %v1199_v33 = vmul.f32 %v1187_v27, %v1090_v53  ;;  %v1205_v36 = vpack.c.bf16 %v1198_v30, %v1192_v34  ;;  %v2769_v53 = vld [vmem:[#allocation5 + $0xc4] ss:$8 sps:$4 sm:$0xff]   ;;  %v2820_v34 = vld [vmem:[#allocation5 + $0x214] ss:$8 sps:$4 sm:$0xff]  }
 0x197   :  { %v1206_v35 = vpack.c.bf16 %v1199_v33, %v1193_v31  ;;  %v2815_v33 = vld [vmem:[#allocation5 + $0x220] ss:$8 sps:$4 sm:$0xff]  }
 0x199   :  { %1307 = vmatprep.subr.bf16.mxu1 %v1206_v35  ;;  %v2818_v35 = vld [vmem:[#allocation5 + $0x210] ss:$8 sps:$4 sm:$0xff]  }
 0x19a   :  { %1308 = vmatpush1.bf16.msra.mxu1 %v1205_v36  ;;  %v2821_v36 = vld [vmem:[#allocation5 + $0x200] ss:$8 sps:$4 sm:$0xff]  }
 0x19b   :  { %1928 = vmatprep.subr.bf16.mxu1 %v2706_v12  ;;  %v2823_v12 = vld [vmem:[#allocation5 + $0x204] ss:$8 sps:$4 sm:$0xff]  }
 0x19d   :  { %2376 = vmatmul.mubr.msk.bf16.vlgmr.msra.gmra.mxu1 %vm1207_vm1, %v3118_v7  ;;  %v2733_v7 = vld [vmem:[#allocation5 + $0x24] ss:$8 sps:$4 sm:$0xff]  }
 0x19e   :  { %1929 = vmatpush1.bf16.msra.mxu1 %v2704_v6  ;;  %v2826_v6 = vld [vmem:[#allocation5 + $0x2f4] ss:$8 sps:$4 sm:$0xff]  }
 0x19f   :  { %1930 = vmatprep.subr.bf16.mxu1 %v2709_v22  ;;  %v2824_v22 = vld [vmem:[#allocation5 + $0x2f0] ss:$8 sps:$4 sm:$0xff]  }
 0x1a2   :  { %1931 = vmatpush1.bf16.msra.mxu1 %v2707_v37  ;;  %v2829_v37 = vld [vmem:[#allocation5 + $0x2e4] ss:$8 sps:$4 sm:$0xff]  }
 0x1a3   :  { %1932 = vmatprep.subr.bf16.mxu1 %v2715_v38  ;;  %v2832_v38 = vld [vmem:[#allocation5 + $0x2d4] ss:$8 sps:$4 sm:$0xff]  }
 0x1a6   :  { %1933 = vmatpush1.bf16.msra.mxu1 %v2713_v40  ;;  %v2835_v40 = vld [vmem:[#allocation5 + $0x2c4] ss:$8 sps:$4 sm:$0xff]  }
 0x1a7   :  { %1934 = vmatprep.subr.bf16.mxu1 %v2721_v41  ;;  %v2833_v41 = vld [vmem:[#allocation5 + $0x2c0] ss:$8 sps:$4 sm:$0xff]  }
 0x1aa   :  { %1935 = vmatpush1.bf16.msra.mxu1 %v2719_v42  ;;  %v2838_v42 = vld [vmem:[#allocation5 + $0x2b4] ss:$8 sps:$4 sm:$0xff]  }
 0x1ab   :  { %1936 = vmatprep.subr.bf16.mxu1 %v2727_v43  ;;  %v2836_v43 = vld [vmem:[#allocation5 + $0x2b0] ss:$8 sps:$4 sm:$0xff]  }
 0x1ae   :  { %1937 = vmatpush1.bf16.msra.mxu1 %v2725_v44  ;;  %v2841_v44 = vld [vmem:[#allocation5 + $0x2a4] ss:$8 sps:$4 sm:$0xff]  }
 0x1af   :  { %1938 = vmatprep.subr.bf16.mxu1 %v2733_v7  ;;  %v2839_v7 = vld [vmem:[#allocation5 + $0x2a0] ss:$8 sps:$4 sm:$0xff]  }
 0x1b2   :  { %1939 = vmatpush1.bf16.msra.mxu1 %v2731_v45  ;;  %v2844_v45 = vld [vmem:[#allocation5 + $0x294] ss:$8 sps:$4 sm:$0xff]  }
 0x1b3   :  { %1940 = vmatprep.subr.bf16.mxu1 %v2739_v0  ;;  %v2842_v0 = vld [vmem:[#allocation5 + $0x290] ss:$8 sps:$4 sm:$0xff]  }
 0x1b6   :  { %1941 = vmatpush1.bf16.msra.mxu1 %v2737_v46  ;;  %v2847_v46 = vld [vmem:[#allocation5 + $0x284] ss:$8 sps:$4 sm:$0xff]  }
 0x1b7   :  { %1942 = vmatprep.subr.bf16.mxu1 %v2745_v47  ;;  %v2845_v47 = vld [vmem:[#allocation5 + $0x280] ss:$8 sps:$4 sm:$0xff]  }
 0x1ba   :  { %1943 = vmatpush1.bf16.msra.mxu1 %v2743_v48 }
 0x1bb   :  { %1944 = vmatprep.subr.bf16.mxu1 %v2751_v49 }
 0x1be   :  { %1945 = vmatpush2.bf16.msra.mxu1 %v2749_v50 }
 0x1bf   :  { %1946 = vmatprep.subr.bf16.mxu1 %v2757_v19 }
 0x1c2   :  { %1947 = vmatpush2.bf16.msra.mxu1 %v2755_v51 }
 0x1c3   :  { %1948 = vmatprep.subr.bf16.mxu1 %v2763_v52 }
 0x1c6   :  { %1949 = vmatpush2.bf16.msra.mxu1 %v2761_v1  ;;  %v2848_v1 = vld [vmem:[%s3203_s6 + $0x78] sm:$0xff]  }
 0x1c7   :  { %1950 = vmatprep.subr.bf16.mxu1 %v2769_v53  ;;  %v2849_v53 = vld [vmem:[%s3203_s6 + $0x38] sm:$0xff]   ;;  %2490 = vmatprep.subr.bf16.mxu0 %v2848_v1 }
 0x1ca   :  { %1951 = vmatpush2.bf16.msra.mxu1 %v2767_v54  ;;  %v2850_v54 = vld [vmem:[%s3203_s6 + $0x70] sm:$0xff]  }
 0x1cb   :  { %1952 = vmatprep.subr.bf16.mxu1 %v2775_v55  ;;  %v2851_v55 = vld [vmem:[%s3203_s6 + $0x30] sm:$0xff]  }
 0x1ce   :  { %1953 = vmatpush2.bf16.msra.mxu1 %v2773_v56  ;;  %v2852_v56 = vld [vmem:[%s3203_s6 + $0x68] sm:$0xff]  }
 0x1cf   :  { %1954 = vmatprep.subr.bf16.mxu1 %v2781_v57  ;;  %v2853_v57 = vld [vmem:[%s3203_s6 + $0x28] sm:$0xff]  }
 0x1d2   :  { %1955 = vmatpush2.bf16.msra.mxu1 %v2779_v59  ;;  %v2854_v59 = vld [vmem:[%s3203_s6 + $0x60] sm:$0xff]  }
 0x1d3   :  { %1956 = vmatprep.subr.bf16.mxu1 %v2787_v60  ;;  %v2855_v60 = vld [vmem:[%s3203_s6 + $0x20] sm:$0xff]  }
 0x1d6   :  { %1957 = vmatpush2.bf16.msra.mxu1 %v2785_v61  ;;  %v2856_v61 = vld [vmem:[%s3203_s6 + $0x58] sm:$0xff]  }
 0x1d7   :  { %1958 = vmatprep.subr.bf16.mxu1 %v2793_v3  ;;  %v2857_v3 = vld [vmem:[%s3203_s6 + $0x18] sm:$0xff]  }
 0x1da   :  { %1959 = vmatpush2.bf16.msra.mxu1 %v2791_v4  ;;  %v2858_v4 = vld [vmem:[%s3203_s6 + $0x50] sm:$0xff]  }
 0x1db   :  { %2010 = vmatprep.subr.bf16.mxu1 %v2802_v5  ;;  %v2859_v5 = vld [vmem:[%s3203_s6 + $0x10] sm:$0xff]  }
 0x20d   :  { %v1245_v17 = vpop.f32.mrf.mxu1 }
 0x20e   :  { %v1334_v23 = vpack.c.bf16 %v1245_v17, %v1245_v17  ;;  %v2860_v17 = vld [vmem:[%s3203_s6 + $0x48] sm:$0xff]  }
 0x20f   :  { %v1247_v32 = vpop.f32.mrf.mxu1 }
 0x210   :  { %v1335_v8 = vpack.c.bf16 %v1247_v32, %v1247_v32  ;;  %v2862_v32 = vld [vmem:[%s3203_s6 + $0x40] sm:$0xff]  }
 0x211   :  { %v1249_v9 = vpop.f32.mrf.mxu1 }
 0x212   :  { %1960 = vmatprep.mubr.bf16.mxu1 %v1335_v8  ;;  %v2863_v8 = vld [vmem:[%s3203_s6] sm:$0xff]  }
 0x213   :  { %v1250_v13 = vpop.f32.mrf.mxu1  ;;  %1961 = vmatmul.mubr.bf16.vlgmr.msra.gmra.mxu1 %v1334_v23  ;;  %v2861_v23 = vld [vmem:[%s3203_s6 + $0x8] sm:$0xff]  }
 0x214   :  { %2011 = vmatpush1.bf16.msra.mxu1 %v2800_v10  ;;  %v1436_v13 = vld [vmem:[%s3202_s5] sm:$0x3] }
 0x215   :  { %2012 = vmatprep.subr.bf16.mxu1 %v2805_v11 }
 0x218   :  { %2013 = vmatpush1.bf16.msra.mxu1 %v2803_v14 }
 0x219   :  { %2014 = vmatprep.subr.bf16.mxu1 %v2808_v15  ;;  %v1441_v15 = vrot.slane %v1436_v13, %v187_v63 }
 0x21c   :  { %2015 = vmatpush1.bf16.msra.mxu1 %v2806_v16 }
 0x21d   :  { %2016 = vmatprep.subr.bf16.mxu1 %v2811_v18 }
 0x21e   :  { %v1286_v21 = vpop.f32.mrf.mxu1 }
 0x21f   :  { %v1336_v25 = vpack.c.bf16 %v1286_v21, %v1286_v21 }
 0x220   :  { %v1288_v26 = vpop.f32.mrf.mxu1  ;;  %2017 = vmatpush1.bf16.msra.mxu1 %v2809_v20 }
 0x221   :  { %v1337_v27 = vpack.c.bf16 %v1288_v26, %v1288_v26  ;;  %2018 = vmatprep.subr.bf16.mxu1 %v2814_v24  ;;  %v1445_v26 = vrot.slane %v1436_v13, %v191_v2 }
 0x222   :  { %v1290_v30 = vpop.f32.mrf.mxu1 }
 0x223   :  { %2001 = vmatprep.mubr.bf16.mxu0 %v1337_v27 }
 0x224   :  { %2002 = vmatmul.mubr.bf16.vlgmr.msra.gmra.mxu0 %v1336_v25  ;;  %v1291_v31 = vpop.f32.mrf.mxu1  ;;  %2019 = vmatpush1.bf16.msra.mxu1 %v2812_v28 }
 0x225   :  { %2020 = vmatprep.subr.bf16.mxu1 %v2817_v29  ;;  %2491 = vmatpush3.bf16.msra.mxu0 %v2849_v53 }
 0x226   :  { %2492 = vmatprep.subr.bf16.mxu0 %v2850_v54 }
 0x228   :  { %2021 = vmatpush1.bf16.msra.mxu1 %v2815_v33 }
 0x229   :  { %2022 = vmatprep.subr.bf16.mxu1 %v2820_v34  ;;  %2493 = vmatpush3.bf16.msra.mxu0 %v2851_v55 }
 0x22a   :  { %2494 = vmatprep.subr.bf16.mxu0 %v2852_v56 }
 0x22c   :  { %2023 = vmatpush1.bf16.msra.mxu1 %v2818_v35 }
 0x22d   :  { %2024 = vmatprep.subr.bf16.mxu1 %v2823_v12  ;;  %2495 = vmatpush3.bf16.msra.mxu0 %v2853_v57 }
 0x22e   :  { %2496 = vmatprep.subr.bf16.mxu0 %v2854_v59 }
 0x230   :  { %2025 = vmatpush1.bf16.msra.mxu1 %v2821_v36 }
 0x231   :  { %2026 = vmatprep.subr.bf16.mxu1 %v2826_v6  ;;  %2497 = vmatpush3.bf16.msra.mxu0 %v2855_v60 }
 0x232   :  { %2498 = vmatprep.subr.bf16.mxu0 %v2856_v61 }
 0x234   :  { %2027 = vmatpush2.bf16.msra.mxu1 %v2824_v22 }
 0x235   :  { %2028 = vmatprep.subr.bf16.mxu1 %v2829_v37  ;;  %2499 = vmatpush3.bf16.msra.mxu0 %v2857_v3 }
 0x236   :  { %2500 = vmatprep.subr.bf16.mxu0 %v2858_v4 }
 0x238   :  { %2029 = vmatpush2.bf16.msra.mxu1 %v2827_v58 }
 0x239   :  { %2030 = vmatprep.subr.bf16.mxu1 %v2832_v38  ;;  %2501 = vmatpush3.bf16.msra.mxu0 %v2859_v5 }
 0x23a   :  { %2502 = vmatprep.subr.bf16.mxu0 %v2860_v17 }
 0x23c   :  { %2031 = vmatpush2.bf16.msra.mxu1 %v2830_v39 }
 0x23d   :  { %2032 = vmatprep.subr.bf16.mxu1 %v2835_v40  ;;  %2503 = vmatpush3.bf16.msra.mxu0 %v2861_v23 }
 0x23e   :  { %2504 = vmatprep.subr.bf16.mxu0 %v2862_v32 }
 0x240   :  { %2033 = vmatpush2.bf16.msra.mxu1 %v2833_v41 }
 0x241   :  { %2034 = vmatprep.subr.bf16.mxu1 %v2838_v42  ;;  %2505 = vmatpush3.bf16.msra.mxu0 %v2863_v8 }
 0x244   :  { %2035 = vmatpush2.bf16.msra.mxu1 %v2836_v43 }
 0x245   :  { %2036 = vmatprep.subr.bf16.mxu1 %v2841_v44 }
 0x248   :  { %2037 = vmatpush2.bf16.msra.mxu1 %v2839_v7 }
 0x249   :  { %2038 = vmatprep.subr.bf16.mxu1 %v2844_v45 }
 0x24c   :  { %2039 = vmatpush2.bf16.msra.mxu1 %v2842_v0 }
 0x24d   :  { %2040 = vmatprep.subr.bf16.mxu1 %v2847_v46 }
 0x250   :  { %2041 = vmatpush2.bf16.msra.mxu1 %v2845_v47 }
 0x25d   :  { %v1327_v48 = vpop.f32.mrf.mxu1 }
 0x25e   :  { %v1338_v19 = vpack.c.bf16 %v1327_v48, %v1327_v48 }
 0x25f   :  { %v1329_v49 = vpop.f32.mrf.mxu1 }
 0x260   :  { %v1339_v50 = vpack.c.bf16 %v1329_v49, %v1329_v49 }
 0x261   :  { %v1331_v51 = vpop.f32.mrf.mxu1 }
 0x262   :  { %2042 = vmatprep.mubr.bf16.mxu1 %v1339_v50 }
 0x263   :  { %v1332_v52 = vpop.f32.mrf.mxu1  ;;  %2043 = vmatmul.mubr.bf16.vlgmr.msra.gmra.mxu1 %v1338_v19 }
 0x2d3   :  { %v1962_v10 = vpop.f32.mrf.mxu1 }
 0x2d4   :  { %v1963_v16 = vadd.f32 %v1962_v10, %v1441_v15 }
 0x2d5   :  { %v1964_v9 = vpop.f32.mrf.mxu1 }
 0x2d6   :  { %v1965_v27 = vadd.f32 %v1964_v9, %v1445_v26 }
 0x2d7   :  { %v1966_v11 = vpop.f32.mrf.mxu1 }
 0x2d9   :  { %v1967_v14 = vpop.f32.mrf.mxu1 }
 0x2e4   :  { %v2003_v18 = vpop.f32.mrf.mxu0 }
 0x2e5   :  { %v2004_v20 = vadd.f32 %v2003_v18, %v1963_v16 }
 0x2e6   :  { %v2005_v21 = vpop.f32.mrf.mxu0 }
 0x2e7   :  { %v2006_v29 = vadd.f32 %v2005_v21, %v1965_v27 }
 0x2e8   :  { %v2007_v24 = vpop.f32.mrf.mxu0 }
 0x2ea   :  { %v2008_v25 = vpop.f32.mrf.mxu0 }
 0x323   :  { %v2044_v28 = vpop.f32.mrf.mxu1 }
 0x324   :  { %v2045_v30 = vadd.f32 %v2044_v28, %v2004_v20 }
 0x325   :  { %v2046_v31 = vpop.f32.mrf.mxu1 }
 0x326   :  { %v2047_v33 = vadd.f32 %v2046_v31, %v2006_v29  ;;  %v2051_v34 = vmax.f32 %v2045_v30, 0.0 }
 0x327   :  { %v2048_v35 = vpop.f32.mrf.mxu1 }
 0x328   :  { %v2052_v12 = vmax.f32 %v2047_v33, 0.0  ;;  %v2053_v6 = vpack.c.bf16 %v2051_v34, %v2051_v34 }
 0x329   :  { %v2049_v36 = vpop.f32.mrf.mxu1 }
 0x32a   :  { %v2054_v63 = vpack.c.bf16 %v2052_v12, %v2052_v12 }
 0x32c   :  { %2222 = vmatprep.mubr.bf16.mxu0 %v2054_v63 }
 0x32d   :  { %2223 = vmatmul.mubr.bf16.vlgmr.msra.gmra.mxu0 %v2053_v6 }
 0x3ed   :  { %v2506_v22 = vpop.f32.mrf.mxu0 }
 0x3ef   :  { %v2507_v2 = vpop.f32.mrf.mxu0 }
 0x3f0   :  { %v2508_v37 = vadd.f32 %v2507_v2, %v2506_v22 }
 0x3f1   :  { %v2509_v58 = vpop.f32.mrf.mxu0 }
 0x3f2   :  { %v2225_v38 = vadd.f32 %v2508_v37, %v2473_v62 }
 0x3f3   :  { %v2510_v39 = vpop.f32.mrf.mxu0 }
 0x3f4   :  { %2231 = vst.msk [vmem:[#allocation7] sm:$0x3] %vm2230_vm2, %v2225_v38 }
 0x3f5   :  { %2939 = shalt.err (!%p2936_p0)
}
 0x3f6   :  { %2241 = dma.vmem_to_hbm [thread:$0]  %s2239_s10, 32, %s3205_s8, [#allocation4]  }
 0x3f7   :  { %2952 = dma.done.wait [#allocation4], 32  }
 0x3f8   :  { %2953 = vsyncadd [#allocation4], 4294967264 }
 0x3f9   :  { %2245 = vsyncpa [#allocation3], 1 }
 0x3fa   :  { %2246 = vsyncpa [#allocation6], 1 }
 0x3fb   :  { %2247 = vsyncpa [#allocation4], 1 }

</bundles_post_ra>
